<compile_context>
chip_gen: v7x
topology: tpu7x:2x2x1
jax: 0.10.0
libtpu: 0.0.40
codegen_flags: <defaults>
</compile_context>

<pallas_src>
import jax
import jax.numpy as jnp
from jax.experimental import pallas as pl
from jax.experimental.pallas import tpu as pltpu


# ----------------------------- Pallas kernels --------------------------------

def _time_mlp_kernel(t_ref, w1_ref, b1_ref, w2_ref, b2_ref, o_ref):
    """t_emb = SiLU(t @ W1 + b1) @ W2 + b2.

    t_ref:  (B, E)    timestep embedding
    w1_ref: (E, Hd)   first Linear weight (transposed vs. PyTorch storage)
    b1_ref: (1, Hd)
    w2_ref: (Hd, C)   second Linear weight (transposed vs. PyTorch storage)
    b2_ref: (1, C)
    o_ref:  (B, C)
    """
    t = t_ref[...].astype(jnp.float32)
    h = jnp.dot(t, w1_ref[...].astype(jnp.float32),
                preferred_element_type=jnp.float32) + b1_ref[...]
    h = h * jax.nn.sigmoid(h)                       # SiLU
    e = jnp.dot(h, w2_ref[...].astype(jnp.float32),
                preferred_element_type=jnp.float32) + b2_ref[...]
    o_ref[...] = e.astype(o_ref.dtype)


def _add_time_silu_kernel(x_ref, temb_ref, o_ref):
    """out = SiLU(x + t_emb) on one (TR, TC) tile.

    x_ref:    (TR, TC)  rows = flattened (batch, channel); lanes = flattened H*W
    temb_ref: (TR, 1)   per-row time-embedding value, broadcast along the lane axis
    o_ref:    (TR, TC)
    """
    y = x_ref[...].astype(jnp.float32) + temb_ref[...]
    o_ref[...] = (y * jax.nn.sigmoid(y)).astype(o_ref.dtype)


# ------------------------------ kernel wrappers -------------------------------

def _row_tile(m, cap=256):
    """Sublane tile: multiple of 8 (or full dim when m < 8)."""
    if m < 8:
        return m
    return min(cap, (m // 8) * 8)


def _col_tile(n, cap=1024):
    """Lane tile: multiple of 128 (or full dim when n < 128)."""
    if n < 128:
        return n
    return min(cap, (n // 128) * 128)


def time_mlp_forward(x, t, params):
    """Matches TimeMLP.forward.  x: (B, C, H, W) NCHW, t: (B, E)."""
    b, c, h, w = x.shape
    hd = params["w1"].shape[1]
    assert params["w2"].shape[1] == c, "MLP out_dim must equal x channel dim"

    # --- kernel 1: 2-layer MLP on the timestep embedding (tiny, one step) -----
    t_emb = pl.pallas_call(
        _time_mlp_kernel,
        out_shape=jax.ShapeDtypeStruct((b, c), jnp.float32),
        in_specs=[pl.BlockSpec(memory_space=pltpu.MemorySpace.VMEM)] * 5,
        out_specs=pl.BlockSpec(memory_space=pltpu.MemorySpace.VMEM),
    )(t, params["w1"], params["b1"].reshape(1, hd),
      params["w2"], params["b2"].reshape(1, c))

    # --- kernel 2: fused broadcast-add + SiLU over x (lane-dense, tiled) ------
    m, hw = b * c, h * w
    x2d = x.reshape(m, hw)             # free reshape of contiguous NCHW
    temb_col = t_emb.reshape(m, 1)     # row r = (batch r // C, channel r % C)

    tr = _row_tile(m)
    tc = _col_tile(hw)
    grid = (pl.cdiv(m, tr), pl.cdiv(hw, tc))

    y2d = pl.pallas_call(
        _add_time_silu_kernel,
        out_shape=jax.ShapeDtypeStruct((m, hw), x.dtype),
        grid=grid,
        in_specs=[
            pl.BlockSpec((tr, tc), lambda i, j: (i, j)),
            pl.BlockSpec((tr, 1), lambda i, j: (i, 0)),
        ],
        out_specs=pl.BlockSpec((tr, tc), lambda i, j: (i, j)),
        compiler_params=pltpu.CompilerParams(
            dimension_semantics=("parallel", "parallel")),
    )(x2d, temb_col)
    return y2d.reshape(b, c, h, w)


# --------------------------- parameters & reference ---------------------------

def init_params(key, embedding_dim, hidden_dim, out_dim):
    k1, k2, k3, k4 = jax.random.split(key, 4)
    s1 = 1.0 / (embedding_dim ** 0.5)
    s2 = 1.0 / (hidden_dim ** 0.5)
    return {
        "w1": jax.random.uniform(k1, (embedding_dim, hidden_dim), jnp.float32, -s1, s1),
        "b1": jax.random.uniform(k2, (hidden_dim,), jnp.float32, -s1, s1),
        "w2": jax.random.uniform(k3, (hidden_dim, out_dim), jnp.float32, -s2, s2),
        "b2": jax.random.uniform(k4, (out_dim,), jnp.float32, -s2, s2),
    }


def reference_forward(x, t, params):
    h = t @ params["w1"] + params["b1"]
    h = h * jax.nn.sigmoid(h)                        # SiLU
    e = h @ params["w2"] + params["b2"]
    y = x + e[:, :, None, None]
    return y * jax.nn.sigmoid(y)                     # SiLU


# ----------------------------------- main --------------------------------------

if __name__ == "__main__":
    key = jax.random.PRNGKey(0)
    k_x, k_t, k_p = jax.random.split(key, 3)

    B, C, H, W = 2, 4, 16, 16          # x channels == MLP out_dim
    EMB, HID = 8, 32

    x = jax.random.normal(k_x, (B, C, H, W), jnp.float32)
    t = jax.random.normal(k_t, (B, EMB), jnp.float32)
    params = init_params(k_p, EMB, HID, C)

    out = jax.jit(time_mlp_forward)(x, t, params)
    out = jax.block_until_ready(out)
    assert out.shape == (B, C, H, W), out.shape

    ref = reference_forward(x, t, params)
    max_err = float(jnp.max(jnp.abs(out - ref)))
    assert max_err < 1e-4, f"mismatch vs reference, max abs err = {max_err}"

    print("KERNEL_OK")
</pallas_src>

<mosaic_0001>
module attributes {stable_mosaic.version = 11 : i64} {
  func.func @_time_mlp_kernel(%arg0: memref<2x8xf32, #tpu.memory_space<vmem>>, %arg1: memref<8x32xf32, #tpu.memory_space<vmem>>, %arg2: memref<1x32xf32, #tpu.memory_space<vmem>>, %arg3: memref<32x4xf32, #tpu.memory_space<vmem>>, %arg4: memref<1x4xf32, #tpu.memory_space<vmem>>, %arg5: memref<2x4xf32, #tpu.memory_space<vmem>>) attributes {dimension_semantics = [], scalar_prefetch = 0 : i64, scratch_operands = 0 : i64, tpu.core_type = #tpu.core_type<tc>} {
    %c0 = arith.constant 0 : index
    %c0_0 = arith.constant 0 : index
    %0 = vector.load %arg0[%c0, %c0_0] : memref<2x8xf32, #tpu.memory_space<vmem>>, vector<2x8xf32>
    %c0_1 = arith.constant 0 : index
    %c0_2 = arith.constant 0 : index
    %1 = vector.load %arg1[%c0_1, %c0_2] : memref<8x32xf32, #tpu.memory_space<vmem>>, vector<8x32xf32>
    %cst = arith.constant dense<0.000000e+00> : vector<2x32xf32>
    %2 = tpu.matmul %0, %1, %cst {dimension_numbers = #tpu.dot_dimension_numbers<[1], [0], [0], [1], [0, 0, 1, 1], [], []>} : vector<2x8xf32>, vector<8x32xf32>, vector<2x32xf32> -> vector<2x32xf32>
    %c0_3 = arith.constant 0 : index
    %c0_4 = arith.constant 0 : index
    %3 = vector.load %arg2[%c0_3, %c0_4] : memref<1x32xf32, #tpu.memory_space<vmem>>, vector<1x32xf32>
    %4 = vector.broadcast %3 : vector<1x32xf32> to vector<2x32xf32>
    %5 = arith.addf %2, %4 : vector<2x32xf32>
    %6 = arith.negf %5 : vector<2x32xf32>
    %7 = math.exp %6 : vector<2x32xf32>
    %cst_5 = arith.constant 1.000000e+00 : f32
    %8 = vector.broadcast %cst_5 : f32 to vector<2x32xf32>
    %9 = arith.addf %8, %7 : vector<2x32xf32>
    %10 = arith.divf %8, %9 : vector<2x32xf32>
    %11 = arith.mulf %5, %10 : vector<2x32xf32>
    %c0_6 = arith.constant 0 : index
    %c0_7 = arith.constant 0 : index
    %12 = vector.load %arg3[%c0_6, %c0_7] : memref<32x4xf32, #tpu.memory_space<vmem>>, vector<32x4xf32>
    %cst_8 = arith.constant dense<0.000000e+00> : vector<2x4xf32>
    %13 = tpu.matmul %11, %12, %cst_8 {dimension_numbers = #tpu.dot_dimension_numbers<[1], [0], [0], [1], [0, 0, 1, 1], [], []>} : vector<2x32xf32>, vector<32x4xf32>, vector<2x4xf32> -> vector<2x4xf32>
    %c0_9 = arith.constant 0 : index
    %c0_10 = arith.constant 0 : index
    %14 = vector.load %arg4[%c0_9, %c0_10] : memref<1x4xf32, #tpu.memory_space<vmem>>, vector<1x4xf32>
    %15 = vector.broadcast %14 : vector<1x4xf32> to vector<2x4xf32>
    %16 = arith.addf %13, %15 : vector<2x4xf32>
    %c0_11 = arith.constant 0 : index
    %c0_12 = arith.constant 0 : index
    %17 = vector.load %arg5[%c0_11, %c0_12] : memref<2x4xf32, #tpu.memory_space<vmem>>, vector<2x4xf32>
    tpu.vector_store %arg5[%c0_11, %c0_12], %16 {strides = array<i32>} : memref<2x4xf32, #tpu.memory_space<vmem>>, vector<2x4xf32>,
    return
  }
}

module attributes {stable_mosaic.version = 11 : i64} {
  func.func @_add_time_silu_kernel(%arg0: i32, %arg1: i32, %arg2: memref<8x256xf32, #tpu.memory_space<vmem>>, %arg3: memref<8x1xf32, #tpu.memory_space<vmem>>, %arg4: memref<8x256xf32, #tpu.memory_space<vmem>>) attributes {dimension_semantics = [#tpu.dimension_semantics<parallel>, #tpu.dimension_semantics<parallel>], iteration_bounds = array<i64: 1, 1>, scalar_prefetch = 0 : i64, scratch_operands = 0 : i64, tpu.core_type = #tpu.core_type<tc>, window_params = [{transform_indices = @transform_0, window_bounds = array<i64: 8, 256>}, {transform_indices = @transform_1, window_bounds = array<i64: 8, 1>}, {transform_indices = @transform_2, window_bounds = array<i64: 8, 256>}]} {
    %c0 = arith.constant 0 : index
    %c0_0 = arith.constant 0 : index
    %0 = vector.load %arg2[%c0, %c0_0] : memref<8x256xf32, #tpu.memory_space<vmem>>, vector<8x256xf32>
    %c0_1 = arith.constant 0 : index
    %c0_2 = arith.constant 0 : index
    %1 = vector.load %arg3[%c0_1, %c0_2] : memref<8x1xf32, #tpu.memory_space<vmem>>, vector<8x1xf32>
    %2 = vector.broadcast %1 : vector<8x1xf32> to vector<8x256xf32>
    %3 = arith.addf %0, %2 : vector<8x256xf32>
    %4 = arith.negf %3 : vector<8x256xf32>
    %5 = math.exp %4 : vector<8x256xf32>
    %cst = arith.constant 1.000000e+00 : f32
    %6 = vector.broadcast %cst : f32 to vector<8x256xf32>
    %7 = arith.addf %6, %5 : vector<8x256xf32>
    %8 = arith.divf %6, %7 : vector<8x256xf32>
    %9 = arith.mulf %3, %8 : vector<8x256xf32>
    %c0_3 = arith.constant 0 : index
    %c0_4 = arith.constant 0 : index
    %10 = vector.load %arg4[%c0_3, %c0_4] : memref<8x256xf32, #tpu.memory_space<vmem>>, vector<8x256xf32>
    tpu.vector_store %arg4[%c0_3, %c0_4], %9 {strides = array<i32>} : memref<8x256xf32, #tpu.memory_space<vmem>>, vector<8x256xf32>,
    return
  }
  func.func @transform_0(%arg0: i32, %arg1: i32) -> (i32, i32) {
    %c0_i32 = arith.constant 0 : i32
    return %arg0, %arg1 : i32, i32
  }
  func.func @transform_1(%arg0: i32, %arg1: i32) -> (i32, i32) {
    %c0_i32 = arith.constant 0 : i32
    %c0_i32_0 = arith.constant 0 : i32
    return %arg0, %c0_i32 : i32, i32
  }
  func.func @transform_2(%arg0: i32, %arg1: i32) -> (i32, i32) {
    %c0_i32 = arith.constant 0 : i32
    return %arg0, %arg1 : i32, i32
  }
}

</mosaic_0001>

<bundles_post_ra>
// kernel: time_mlp_forward.3
= control target key start
LH: loop header
LB: loop body
LE: loop exit
PB: predicated region body
PF: predicated region fallthrough
CT: control target
= control target key end

     0   :  { %v53_v0 = vmov 0   ;;  %s84_s1 = inlined_call_operand.vmem [shape: f32[8,1], index: 1, kind: input, shape index: {}]   ;;  %s85_s0 = inlined_call_operand.vmem [shape: f32[8,256], index: 0, kind: input, shape index: {}]   ;;  %s86_s2 = inlined_call_operand.vmem [shape: f32[8,256], index: 2, kind: output, shape index: {}]  }
   0x1   :  { %44 = vset.pattern.permute.xlu0 %v53_v0  ;;  %v13_v1 = vld [vmem:[%s84_s1] sm:$0xff]  ;;  %v12_v3 = vld [vmem:[%s85_s0 + $0x8] sm:$0xff] }
   0x2   :  { %16 = vperm.xlu0 %44, %v13_v1   ;;  %v11_v2 = vld [vmem:[%s85_s0] sm:$0xff] }
  0x81   :  { %v17_v4 = vpop.permute.xlu0 %16 }
  0x82   :  { %v19_v5 = vadd.f32 %v17_v4, %v11_v2  ;;  %v20_v6 = vadd.f32 %v17_v4, %v12_v3 }
  0x84   :  { %v41_v7 = vmul.f32 -1.442695, %v19_v5  ;;  %v42_v8 = vmul.f32 -1.442695, %v20_v6 }
  0x86   :  { %45 = vpow2.f32 %v41_v7 }
  0x87   :  { %47 = vpow2.f32 %v42_v8 }
  0x90   :  { %v46_v9 = vpop.eup %45 }
  0x91   :  { %v48_v10 = vpop.eup %47  ;;  %v27_v11 = vadd.f32 1.0, %v46_v9 }
  0x92   :  { %v28_v12 = vadd.f32 1.0, %v48_v10 }
  0x93   :  { %49 = vrcp.f32 %v27_v11 }
  0x94   :  { %51 = vrcp.f32 %v28_v12 }
  0x9d   :  { %v50_v13 = vpop.eup %49 }
  0x9e   :  { %v52_v14 = vpop.eup %51  ;;  %v33_v15 = vmul.f32 %v50_v13, %v19_v5 }
  0x9f   :  { %v34_v16 = vmul.f32 %v52_v14, %v20_v6 }
  0xa0   :  { %35 = vst [vmem:[%s86_s2] sm:$0xff] %v33_v15 }
  0xa1   :  { %36 = vst [vmem:[%s86_s2 + $0x8] sm:$0xff] %v34_v16 }

// kernel: time_mlp_forward.2
= control target key start
LH: loop header
LB: loop body
LE: loop exit
PB: predicated region body
PF: predicated region fallthrough
CT: control target
= control target key end

     0   :  { %vm29_vm0 = vcmask 64512   ;;  %v242_v0 = vmov 0.0   ;;  %vm243_vm1 = vmmov 0   ;;  %v244_v6 = vmov 0.0|0.0   ;;  %s302_s1 = inlined_call_operand.vmem [shape: f32[8,32], index: 1, kind: input, shape index: {}]   ;;  %s303_s0 = inlined_call_operand.vmem [shape: f32[2,8], index: 0, kind: input, shape index: {}]   ;;  %s304_s3 = inlined_call_operand.vmem [shape: f32[32,4], index: 3, kind: input, shape index: {}]   ;;  %s305_s2 = inlined_call_operand.vmem [shape: f32[1,32], index: 2, kind: input, shape index: {}]   ;;  %s306_s4 = inlined_call_operand.vmem [shape: f32[1,4], index: 4, kind: input, shape index: {}]   ;;  %s307_s5 = inlined_call_operand.vmem [shape: f32[2,4], index: 5, kind: output, shape index: {}]  }
   0x1   :  { %213 = vmatprep.subr.mxu0 %v242_v0  ;;  %v21_v1 = vld [vmem:[%s302_s1] sm:$0xff]  ;;  %215 = vmatprep.mubr.msk.f32.mxu0 %vm243_vm1, %v242_v0  ;;  %v111_v4 = vld [vmem:[%s304_s3 + $0x8] sm:$0xff]  ;;  %v112_v7 = vld [vmem:[%s304_s3 + $0x10] sm:$0xff]  ;;  %vm121_vm2 = vcmask 261120   ;;  %vm195_vm3 = vcmask 25600  }
   0x2   :  { %v20_v2 = vld [vmem:[%s303_s0] sm:$0x3]  ;;  %214 = vmatpush3.msra.mxu0 %v21_v1  ;;  %226 = vmatprep.mubr.msk.f32.mxu1 %vm243_vm1, %v242_v0  ;;  %v113_v8 = vld [vmem:[%s304_s3 + $0x18] sm:$0xff] }
   0x3   :  { %216 = vmatmul.mubr.msk.f32.vlgmr.msra.gmra.mrb[0].mxu0 %vm29_vm0, %v20_v2  ;;  %v110_v3 = vld [vmem:[%s304_s3] sm:$0xff]  ;;  %229 = vmatprep.subr.bf16.mxu1 %v244_v6  ;;  %v233_v9 = vpack.c.bf16 %v113_v8, %v112_v7 }
   0x4   :  { %v230_v5 = vpack.c.bf16 %v111_v4, %v110_v3  ;;  %v201_v10 = vld [vmem:[%s305_s2] ss:$0 sm:$0xff] }
   0x5   :  { %v204_v19 = vld [vmem:[%s306_s4] ss:$0 sm:$0xff] }
   0x6   :  { %231 = vmatpush3.bf16.msra.mxu1 %v230_v5 }
   0x7   :  { %232 = vmatprep.subr.bf16.mxu1 %v244_v6 }
   0xa   :  { %234 = vmatpush3.bf16.msra.mxu1 %v233_v9 }
  0xd6   :  { %v99_v11 = vpop.f32.mrb[0].mxu0 }
  0xd7   :  { %v100_v12 = vadd.f32 %v201_v10, %v99_v11  ;;  %v217_v13 = vpop.f32.mrb[1].mxu0 }
  0xd9   :  { %v203_v14 = vmul.f32 -1.442695, %v100_v12 }
  0xdb   :  { %238 = vpow2.f32 %v203_v14 }
  0xe5   :  { %v239_v15 = vpop.eup %238 }
  0xe6   :  { %v106_v16 = vadd.f32 1.0, %v239_v15 }
  0xe8   :  { %240 = vrcp.f32 %v106_v16 }
  0xf2   :  { %v241_v17 = vpop.eup %240 }
  0xf3   :  { %v109_v18 = vmul.f32 %v241_v17, %v100_v12 }
  0xf5   :  { %227 = vmatmul.mubr.msk.f32.vlgmr.msra.gmra.mrb[0].mxu1 %vm121_vm2, %v109_v18 }
 0x1c8   :  { %v191_v20 = vpop.f32.mrb[0].mxu1 }
 0x1c9   :  { %v192_v21 = vadd.f32 %v204_v19, %v191_v20  ;;  %v228_v22 = vpop.f32.mrb[1].mxu1 }
 0x1cb   :  { %196 = vst.msk [vmem:[%s307_s5] sm:$0x3] %vm195_vm3, %v192_v21 }

</bundles_post_ra>
